<compile_context>
chip_gen: v6e
topology: v6e:2x2x1
jax: 0.10.0
libtpu: 0.0.40
codegen_flags: <defaults>
</compile_context>

<pallas_src>
import functools
import math

import jax
import jax.numpy as jnp
from jax.experimental import pallas as pl
from jax.experimental.pallas import tpu as pltpu

LANE = 128
NEG_BIAS = -10000.0


def _round_up(x, m):
    return ((x + m - 1) // m) * m


def sacat_kernel(lens_ref, x_ref, w_ref, b_ref, out_ref, *, D, Dp):
    """One grid step: TB batch elements, both SA layers, fused bf16 projections."""
    TB, S, H = x_ref.shape

    # Additive -10000 padding bias rebuilt from scalar-prefetched lengths (SMEM),
    # replacing the streamed (B,S,S) f32 mask input.
    b0 = pl.program_id(0) * TB
    key_pos = jax.lax.broadcasted_iota(jnp.int32, (1, 1, S), 2)
    rows = [jnp.where(key_pos < lens_ref[b0 + i], 0.0, NEG_BIAS) for i in range(TB)]
    bias = rows[0] if TB == 1 else jnp.concatenate(rows, axis=0)       # (TB, 1, S) f32

    # Fused projection: one bf16 MXU matmul for all six linears (q/k/v of both layers).
    x2d = x_ref[...].reshape(TB * S, H).astype(jnp.bfloat16)
    proj = jnp.dot(x2d, w_ref[...], preferred_element_type=jnp.float32)
    proj = (proj + b_ref[...]).reshape(TB, S, 6 * Dp)                  # f32

    def attend(off):
        # q already carries the 1/sqrt(D) scale (folded into the packed weights/bias).
        # Each role is Dp (128-lane multiple) wide -> lane-aligned slices.
        q = proj[:, :, off:off + Dp].astype(jnp.bfloat16)
        k = proj[:, :, off + Dp:off + 2 * Dp].astype(jnp.bfloat16)
        v = proj[:, :, off + 2 * Dp:off + 3 * Dp].astype(jnp.bfloat16)
        scores = jnp.einsum("bqd,bkd->bqk", q, k,
                            preferred_element_type=jnp.float32) + bias
        scores = scores - jnp.max(scores, axis=-1, keepdims=True)
        p = jnp.exp(scores)                                            # softmax in f32
        inv_l = pl.reciprocal(jnp.sum(p, axis=-1, keepdims=True), approx=True)
        p = (p * inv_l).astype(jnp.bfloat16)
        return jnp.einsum("bqk,bkd->bqd", p, v,
                          preferred_element_type=jnp.float32)          # (TB, S, Dp) f32

    if D % LANE == 0:
        # Dp == D: both half-stores are lane-aligned, unmasked full-width writes.
        out_ref[:, :, 0:D] = attend(0).astype(out_ref.dtype)
        out_ref[:, :, D:2 * D] = attend(3 * Dp).astype(out_ref.dtype)
    else:
        # Misaligned D: emit one full-width store instead of two masked partial stores.
        ctx = jnp.concatenate([attend(0)[:, :, :D], attend(3 * Dp)[:, :, :D]], axis=-1)
        out_ref[...] = ctx.astype(out_ref.dtype)


def _pack_params(params, D, Dp):
    """Pack 6 (H, D) weights / (1, D) biases into bf16 (H, 6*Dp) / (1, 6*Dp).

    Each role is zero-padded to Dp (a 128-lane multiple) so in-kernel slices are
    lane-aligned; the 1/sqrt(D) attention scale is folded into the query weights
    and bias.  Role order: [q1, k1, v1, q2, k2, v2].
    """
    (wq1, bq1, wk1, bk1, wv1, bv1, wq2, bq2, wk2, bk2, wv2, bv2) = params
    inv = 1.0 / math.sqrt(D)

    def pad(a):
        return a if Dp == D else jnp.pad(a, ((0, 0), (0, Dp - D)))

    ws = [wq1 * inv, wk1, wv1, wq2 * inv, wk2, wv2]
    bs = [bq1 * inv, bk1, bv1, bq2 * inv, bk2, bv2]
    w_all = jnp.concatenate([pad(w) for w in ws], axis=1).astype(jnp.bfloat16)
    b_all = jnp.concatenate([pad(b) for b in bs], axis=1).astype(jnp.bfloat16)
    return w_all, b_all


def _estimate_vmem_bytes(TB, S, H, Dp):
    """Rough VMEM footprint of one grid step (drives TB selection)."""
    f32, bf16 = 4, 2
    rows = TB * S
    x_blk = rows * H * f32 * 2                  # double-buffered input block
    o_blk = rows * H * f32 * 2                  # double-buffered output block
    wgt = H * 6 * Dp * bf16 + 6 * Dp * bf16     # single-buffered constant weights/bias
    proj = rows * 6 * Dp * f32                  # fused projection result
    qkv = rows * 3 * Dp * bf16                  # bf16 casts of one layer's q/k/v
    attn = TB * S * S * f32 * 2                 # scores + probs (one layer live at a time)
    ctx = rows * Dp * f32 * 2                   # both context tiles
    return x_blk + o_blk + wgt + proj + qkv + attn + ctx


def _pick_batch_tile(B, S, H, Dp, budget_bytes, min_grid=2):
    """Largest divisor of B that fits the VMEM budget while keeping >= min_grid
    grid steps (so both v7x TensorCores get work under 'parallel' semantics).
    For v6e-sized problems, larger TB*S (multiples of 256 rows) falls out of the
    budget automatically; the toy shapes here are too small for that to matter."""
    best = 1
    for tb in range(1, B + 1):
        if B % tb:
            continue
        if B >= min_grid and (B // tb) < min_grid:
            continue
        if _estimate_vmem_bytes(tb, S, H, Dp) <= budget_bytes:
            best = tb
    return best


def sacat_forward(hidden_states, key_lengths, params,
                  vmem_budget_bytes=40 * 1024 * 1024,
                  vmem_limit_bytes=48 * 1024 * 1024):
    """hidden_states: (B, S, H) f32.  key_lengths: (B,) int32 valid-key counts
    (padding mask; same semantics as the reference's (1-mask)*-10000 extended mask).
    params: flat tuple (wq1, bq1, wk1, bk1, wv1, bv1, wq2, bq2, wk2, bk2, wv2, bv2)."""
    B, S, H = hidden_states.shape
    D = H // 2
    Dp = _round_up(D, LANE)
    w_all, b_all = _pack_params(params, D, Dp)

    TB = _pick_batch_tile(B, S, H, Dp, vmem_budget_bytes)
    grid = (B // TB,)

    x_spec = pl.BlockSpec((TB, S, H), lambda b, lens: (b, 0, 0))
    o_spec = pl.BlockSpec((TB, S, H), lambda b, lens: (b, 0, 0))
    # Constant operands: single-buffered (no point double-buffering an invariant block).
    const_kwargs = {}
    if hasattr(pl, "Buffered"):
        const_kwargs["pipeline_mode"] = pl.Buffered(1)
    w_spec = pl.BlockSpec((H, 6 * Dp), lambda b, lens: (0, 0), **const_kwargs)
    b_spec = pl.BlockSpec((1, 6 * Dp), lambda b, lens: (0, 0), **const_kwargs)

    flops = 2 * B * S * H * (6 * Dp) + 8 * B * S * S * Dp
    bytes_accessed = (B * S * H * 4) * 2 + H * 6 * Dp * 2 + 6 * Dp * 2 + B * 4
    cost = pl.CostEstimate(flops=flops,
                           transcendentals=2 * B * S * S,
                           bytes_accessed=bytes_accessed)

    kernel = functools.partial(sacat_kernel, D=D, Dp=Dp)
    return pl.pallas_call(
        kernel,
        out_shape=jax.ShapeDtypeStruct((B, S, H), jnp.float32),
        grid_spec=pltpu.PrefetchScalarGridSpec(
            num_scalar_prefetch=1,
            grid=grid,
            in_specs=[x_spec, w_spec, b_spec],
            out_specs=o_spec,
        ),
        compiler_params=pltpu.CompilerParams(
            dimension_semantics=("parallel",),
            vmem_limit_bytes=vmem_limit_bytes),
        cost_estimate=cost,
    )(key_lengths.astype(jnp.int32), hidden_states, w_all, b_all)


def sacat_reference(hidden_states, key_lengths, params):
    """Pure-JAX f32 reference matching the PyTorch forward (padding-length mask)."""
    (wq1, bq1, wk1, bk1, wv1, bv1, wq2, bq2, wk2, bk2, wv2, bv2) = params
    B, S, _ = hidden_states.shape
    D = wq1.shape[1]
    key_idx = jnp.arange(S)
    mask = (key_idx[None, None, :] < key_lengths[:, None, None]).astype(jnp.float32)
    mask = jnp.broadcast_to(mask, (B, S, S))
    bias = (1.0 - mask) * NEG_BIAS

    def sa(wq, bq, wk, bk, wv, bv):
        q = hidden_states @ wq + bq[0]
        k = hidden_states @ wk + bk[0]
        v = hidden_states @ wv + bv[0]
        scores = jnp.einsum("bqd,bkd->bqk", q / math.sqrt(D), k) + bias
        probs = jax.nn.softmax(scores, axis=-1)
        return jnp.einsum("bqk,bkd->bqd", probs, v)

    return jnp.concatenate([sa(wq1, bq1, wk1, bk1, wv1, bv1),
                            sa(wq2, bq2, wk2, bk2, wv2, bv2)], axis=-1)


def init_params(key, hidden_size):
    """Deterministic synthetic init (stands in for common_init)."""
    D = hidden_size // 2
    keys = jax.random.split(key, 12)
    params = []
    for i in range(2):            # two SA layers
        for j in range(3):        # q, k, v
            kw = keys[i * 6 + j * 2]
            kb = keys[i * 6 + j * 2 + 1]
            w = jax.random.normal(kw, (hidden_size, D), jnp.float32) * 0.02
            b = jax.random.normal(kb, (1, D), jnp.float32) * 0.02
            params += [w, b]
    return tuple(params)


if __name__ == "__main__":
    B, S, H = 2, 8, 32

    key = jax.random.PRNGKey(0)
    k_x, k_p = jax.random.split(key)
    x = jax.random.normal(k_x, (B, S, H), jnp.float32)

    # Padding mask: batch 0 attends to all 8 keys, batch 1 only to the first 5.
    key_lengths = jnp.array([8, 5], jnp.int32)

    params = init_params(k_p, H)

    out = sacat_forward(x, key_lengths, params)
    out = jax.block_until_ready(out)

    ref = sacat_reference(x, key_lengths, params)
    assert out.shape == (B, S, H)
    # Tolerance accounts for bf16 MXU operands and the EUP approximate reciprocal;
    # real bugs produce errors orders of magnitude larger.
    assert jnp.allclose(out, ref, atol=2e-2, rtol=2e-2), "mismatch vs JAX reference"

    print("KERNEL_OK")
</pallas_src>

<mosaic_0001>
module attributes {stable_mosaic.version = 11 : i64} {
  func.func @sacat_kernel(%arg0: i32, %arg1: memref<2xi32, #tpu.memory_space<smem>>, %arg2: memref<1x8x32xf32, #tpu.memory_space<vmem>>, %arg3: memref<32x768xbf16, #tpu.memory_space<vmem>>, %arg4: memref<1x768xbf16, #tpu.memory_space<vmem>>, %arg5: memref<1x8x32xf32, #tpu.memory_space<vmem>>) attributes {dimension_semantics = [#tpu.dimension_semantics<parallel>], iteration_bounds = array<i64: 2>, scalar_prefetch = 1 : i64, scratch_operands = 0 : i64, tpu.core_type = #tpu.core_type<tc>, window_params = [{transform_indices = @transform_0, window_bounds = array<i64: 1, 8, 32>}, {pipeline_mode = #tpu.pipeline_mode<synchronous>, transform_indices = @transform_1, window_bounds = array<i64: 32, 768>}, {pipeline_mode = #tpu.pipeline_mode<synchronous>, transform_indices = @transform_2, window_bounds = array<i64: 1, 768>}, {transform_indices = @transform_3, window_bounds = array<i64: 1, 8, 32>}]} {
    %c1_i32 = arith.constant 1 : i32
    %0 = arith.muli %arg0, %c1_i32 : i32
    %1 = tpu.iota {dimensions = array<i32: 2>} : vector<1x1x8xi32>
    %c0_i32 = arith.constant 0 : i32
    %2 = arith.addi %0, %c0_i32 : i32
    %3 = arith.index_cast %2 : i32 to index
    %4 = memref.load %arg1[%3] : memref<2xi32, #tpu.memory_space<smem>>
    %5 = vector.broadcast %4 : i32 to vector<1x1x8xi32>
    %6 = arith.cmpi slt, %1, %5 : vector<1x1x8xi32>
    %cst = arith.constant 0.000000e+00 : f32
    %cst_0 = arith.constant -1.000000e+04 : f32
    %7 = vector.broadcast %cst : f32 to vector<1x1x8xf32>
    %8 = vector.broadcast %cst_0 : f32 to vector<1x1x8xf32>
    %9 = arith.select %6, %7, %8 : vector<1x1x8xi1>, vector<1x1x8xf32>
    %c0 = arith.constant 0 : index
    %c0_1 = arith.constant 0 : index
    %c0_2 = arith.constant 0 : index
    %10 = vector.load %arg2[%c0, %c0_1, %c0_2] : memref<1x8x32xf32, #tpu.memory_space<vmem>>, vector<1x8x32xf32>
    %11 = vector.shape_cast %10 : vector<1x8x32xf32> to vector<8x32xf32>
    %12 = arith.truncf %11 : vector<8x32xf32> to vector<8x32xbf16>
    %c0_3 = arith.constant 0 : index
    %c0_4 = arith.constant 0 : index
    %13 = vector.load %arg3[%c0_3, %c0_4] : memref<32x768xbf16, #tpu.memory_space<vmem>>, vector<32x768xbf16>
    %cst_5 = arith.constant dense<0.000000e+00> : vector<8x768xf32>
    %14 = tpu.matmul %12, %13, %cst_5 {dimension_numbers = #tpu.dot_dimension_numbers<[1], [0], [0], [1], [0, 0, 1, 1], [], []>} : vector<8x32xbf16>, vector<32x768xbf16>, vector<8x768xf32> -> vector<8x768xf32>
    %c0_6 = arith.constant 0 : index
    %c0_7 = arith.constant 0 : index
    %15 = vector.load %arg4[%c0_6, %c0_7] : memref<1x768xbf16, #tpu.memory_space<vmem>>, vector<1x768xbf16>
    %16 = arith.extf %15 : vector<1x768xbf16> to vector<1x768xf32>
    %17 = vector.broadcast %16 : vector<1x768xf32> to vector<8x768xf32>
    %18 = arith.addf %14, %17 : vector<8x768xf32>
    %19 = vector.shape_cast %18 : vector<8x768xf32> to vector<1x8x768xf32>
    %20 = vector.extract_strided_slice %19 {offsets = [0, 0, 0], sizes = [1, 8, 128], strides = [1, 1, 1]} : vector<1x8x768xf32> to vector<1x8x128xf32>
    %21 = arith.truncf %20 : vector<1x8x128xf32> to vector<1x8x128xbf16>
    %22 = vector.extract_strided_slice %19 {offsets = [0, 0, 128], sizes = [1, 8, 128], strides = [1, 1, 1]} : vector<1x8x768xf32> to vector<1x8x128xf32>
    %23 = arith.truncf %22 : vector<1x8x128xf32> to vector<1x8x128xbf16>
    %24 = vector.extract_strided_slice %19 {offsets = [0, 0, 256], sizes = [1, 8, 128], strides = [1, 1, 1]} : vector<1x8x768xf32> to vector<1x8x128xf32>
    %25 = arith.truncf %24 : vector<1x8x128xf32> to vector<1x8x128xbf16>
    "tpu.trace_start"() <{level = 10 : i32, message = "bqd,bkd->bqk"}> : () -> ()
    %cst_8 = arith.constant dense<0.000000e+00> : vector<1x8x8xf32>
    %26 = tpu.matmul %21, %23, %cst_8 {dimension_numbers = #tpu.dot_dimension_numbers<[2], [2], [1], [1], [0, 0, 0, 1, 1, 1], [0], [0]>} : vector<1x8x128xbf16>, vector<1x8x128xbf16>, vector<1x8x8xf32> -> vector<1x8x8xf32>
    "tpu.trace_stop"() : () -> ()
    %27 = vector.broadcast %9 : vector<1x1x8xf32> to vector<1x8x8xf32>
    %28 = arith.addf %26, %27 : vector<1x8x8xf32>
    %cst_9 = arith.constant dense<0xFF800000> : vector<1x8xf32>
    %29 = vector.multi_reduction <maximumf>, %28, %cst_9 [2] : vector<1x8x8xf32> to vector<1x8xf32>
    %30 = vector.shape_cast %29 : vector<1x8xf32> to vector<1x8x1xf32>
    %31 = vector.broadcast %30 : vector<1x8x1xf32> to vector<1x8x8xf32>
    %32 = arith.subf %28, %31 : vector<1x8x8xf32>
    %33 = math.exp %32 : vector<1x8x8xf32>
    %cst_10 = arith.constant dense<0.000000e+00> : vector<1x8xf32>
    %34 = vector.multi_reduction <add>, %33, %cst_10 [2] : vector<1x8x8xf32> to vector<1x8xf32>
    %35 = vector.shape_cast %34 : vector<1x8xf32> to vector<1x8x1xf32>
    %36 = tpu.reciprocal %35 {approx = true} : vector<1x8x1xf32> -> vector<1x8x1xf32>
    %37 = vector.broadcast %36 : vector<1x8x1xf32> to vector<1x8x8xf32>
    %38 = arith.mulf %33, %37 : vector<1x8x8xf32>
    %39 = arith.truncf %38 : vector<1x8x8xf32> to vector<1x8x8xbf16>
    "tpu.trace_start"() <{level = 10 : i32, message = "bqk,bkd->bqd"}> : () -> ()
    %cst_11 = arith.constant dense<0.000000e+00> : vector<1x8x128xf32>
    %40 = tpu.matmul %39, %25, %cst_11 {dimension_numbers = #tpu.dot_dimension_numbers<[2], [1], [1], [2], [0, 0, 0, 1, 1, 2], [0], [0]>} : vector<1x8x8xbf16>, vector<1x8x128xbf16>, vector<1x8x128xf32> -> vector<1x8x128xf32>
    "tpu.trace_stop"() : () -> ()
    %41 = vector.extract_strided_slice %40 {offsets = [0, 0, 0], sizes = [1, 8, 16], strides = [1, 1, 1]} : vector<1x8x128xf32> to vector<1x8x16xf32>
    %42 = vector.extract_strided_slice %19 {offsets = [0, 0, 384], sizes = [1, 8, 128], strides = [1, 1, 1]} : vector<1x8x768xf32> to vector<1x8x128xf32>
    %43 = arith.truncf %42 : vector<1x8x128xf32> to vector<1x8x128xbf16>
    %44 = vector.extract_strided_slice %19 {offsets = [0, 0, 512], sizes = [1, 8, 128], strides = [1, 1, 1]} : vector<1x8x768xf32> to vector<1x8x128xf32>
    %45 = arith.truncf %44 : vector<1x8x128xf32> to vector<1x8x128xbf16>
    %46 = vector.extract_strided_slice %19 {offsets = [0, 0, 640], sizes = [1, 8, 128], strides = [1, 1, 1]} : vector<1x8x768xf32> to vector<1x8x128xf32>
    %47 = arith.truncf %46 : vector<1x8x128xf32> to vector<1x8x128xbf16>
    "tpu.trace_start"() <{level = 10 : i32, message = "bqd,bkd->bqk"}> : () -> ()
    %cst_12 = arith.constant dense<0.000000e+00> : vector<1x8x8xf32>
    %48 = tpu.matmul %43, %45, %cst_12 {dimension_numbers = #tpu.dot_dimension_numbers<[2], [2], [1], [1], [0, 0, 0, 1, 1, 1], [0], [0]>} : vector<1x8x128xbf16>, vector<1x8x128xbf16>, vector<1x8x8xf32> -> vector<1x8x8xf32>
    "tpu.trace_stop"() : () -> ()
    %49 = vector.broadcast %9 : vector<1x1x8xf32> to vector<1x8x8xf32>
    %50 = arith.addf %48, %49 : vector<1x8x8xf32>
    %cst_13 = arith.constant dense<0xFF800000> : vector<1x8xf32>
    %51 = vector.multi_reduction <maximumf>, %50, %cst_13 [2] : vector<1x8x8xf32> to vector<1x8xf32>
    %52 = vector.shape_cast %51 : vector<1x8xf32> to vector<1x8x1xf32>
    %53 = vector.broadcast %52 : vector<1x8x1xf32> to vector<1x8x8xf32>
    %54 = arith.subf %50, %53 : vector<1x8x8xf32>
    %55 = math.exp %54 : vector<1x8x8xf32>
    %cst_14 = arith.constant dense<0.000000e+00> : vector<1x8xf32>
    %56 = vector.multi_reduction <add>, %55, %cst_14 [2] : vector<1x8x8xf32> to vector<1x8xf32>
    %57 = vector.shape_cast %56 : vector<1x8xf32> to vector<1x8x1xf32>
    %58 = tpu.reciprocal %57 {approx = true} : vector<1x8x1xf32> -> vector<1x8x1xf32>
    %59 = vector.broadcast %58 : vector<1x8x1xf32> to vector<1x8x8xf32>
    %60 = arith.mulf %55, %59 : vector<1x8x8xf32>
    %61 = arith.truncf %60 : vector<1x8x8xf32> to vector<1x8x8xbf16>
    "tpu.trace_start"() <{level = 10 : i32, message = "bqk,bkd->bqd"}> : () -> ()
    %cst_15 = arith.constant dense<0.000000e+00> : vector<1x8x128xf32>
    %62 = tpu.matmul %61, %47, %cst_15 {dimension_numbers = #tpu.dot_dimension_numbers<[2], [1], [1], [2], [0, 0, 0, 1, 1, 2], [0], [0]>} : vector<1x8x8xbf16>, vector<1x8x128xbf16>, vector<1x8x128xf32> -> vector<1x8x128xf32>
    "tpu.trace_stop"() : () -> ()
    %63 = vector.extract_strided_slice %62 {offsets = [0, 0, 0], sizes = [1, 8, 16], strides = [1, 1, 1]} : vector<1x8x128xf32> to vector<1x8x16xf32>
    %64 = tpu.concatenate %41, %63 in 2 : vector<1x8x16xf32>, vector<1x8x16xf32> -> vector<1x8x32xf32>
    %c0_16 = arith.constant 0 : index
    %c0_17 = arith.constant 0 : index
    %c0_18 = arith.constant 0 : index
    %65 = vector.load %arg5[%c0_16, %c0_17, %c0_18] : memref<1x8x32xf32, #tpu.memory_space<vmem>>, vector<1x8x32xf32>
    tpu.vector_store %arg5[%c0_16, %c0_17, %c0_18], %64 {strides = array<i32>} : memref<1x8x32xf32, #tpu.memory_space<vmem>>, vector<1x8x32xf32>,
    return
  }
  func.func @transform_0(%arg0: i32, %arg1: memref<2xi32, #tpu.memory_space<smem>>) -> (i32, i32, i32) {
    %c0_i32 = arith.constant 0 : i32
    %c0_i32_0 = arith.constant 0 : i32
    %c0_i32_1 = arith.constant 0 : i32
    return %arg0, %c0_i32, %c0_i32_0 : i32, i32, i32
  }
  func.func @transform_1(%arg0: i32, %arg1: memref<2xi32, #tpu.memory_space<smem>>) -> (i32, i32) {
    %c0_i32 = arith.constant 0 : i32
    %c0_i32_0 = arith.constant 0 : i32
    %c0_i32_1 = arith.constant 0 : i32
    return %c0_i32, %c0_i32_0 : i32, i32
  }
  func.func @transform_2(%arg0: i32, %arg1: memref<2xi32, #tpu.memory_space<smem>>) -> (i32, i32) {
    %c0_i32 = arith.constant 0 : i32
    %c0_i32_0 = arith.constant 0 : i32
    %c0_i32_1 = arith.constant 0 : i32
    return %c0_i32, %c0_i32_0 : i32, i32
  }
  func.func @transform_3(%arg0: i32, %arg1: memref<2xi32, #tpu.memory_space<smem>>) -> (i32, i32, i32) {
    %c0_i32 = arith.constant 0 : i32
    %c0_i32_0 = arith.constant 0 : i32
    %c0_i32_1 = arith.constant 0 : i32
    return %arg0, %c0_i32, %c0_i32_0 : i32, i32, i32
  }
}

</mosaic_0001>

<bundles_post_ra>
// kernel: tpu_custom_call.1
= control target key start
LH: loop header
LB: loop body
LE: loop exit
PB: predicated region body
PF: predicated region fallthrough
CT: control target
= control target key end

     0   :  { %s1125_s15 = smov [#allocation3]   ;;  %s1363_s0 = inlined_call_operand.hbm [shape: s32[2], index: 0, kind: input, shape index: {}]   ;;  %s1364_s1 = inlined_call_operand.hbm [shape: f32[2,8,32], index: 1, kind: input, shape index: {}]   ;;  %s1365_s2 = inlined_call_operand.hbm [shape: bf16[32,768], index: 2, kind: input, shape index: {}]   ;;  %s1366_s3 = inlined_call_operand.hbm [shape: bf16[1,768], index: 3, kind: input, shape index: {}]   ;;  %s1367_s4 = inlined_call_operand.hbm [shape: f32[2,8,32], index: 4, kind: output, shape index: {}]  }
   0x1   :  { %10 = dma.hbm_to_smem %s1363_s0, 16, %s1125_s15, [#allocation2] }
   0x2   :  { %1095 = dma.done.wait [#allocation2], 16 }
   0x3   :  { %1096 = vsyncadd [#allocation2], 4294967280 }
   0x4   :  { %12 = sfence }
   0x5   :  { %13 = vsyncpa [#allocation5], 0 }
   0x6   :  { %15 = vsyncpa [#allocation5 + $0x1], 0 }
   0x7   :  { %16 = vsyncpa [#allocation8], 0 }
   0x8   :  { %17 = vsyncpa [#allocation6], 0 }
   0x9   :  { %19 = vsyncpa [#allocation6 + $0x1], 0  ;;  %s1165_s18 = smov 0   ;;  %s1167_s19 = smov 0  }
   0xa   :  { %s1169_s20 = smov 0   ;;  %s1171_s21 = smov 0  }
   0xb LB: > { %s1186_s0 = sadd.s32 4294967295, %s1123_s21   ;;  %s799_s22 = sadd.s32 4294967294, %s1123_s21   ;;  %s1123_s21 = sphi %s1171_s21, %s1389_s21   ;;  %s1119_s20 = sphi %s1169_s20, %s1388_s20   ;;  %s1115_s19 = sphi %s1167_s19, %s1387_s19   ;;  %s1111_s18 = sphi %s1165_s18, %s1386_s18  }
   0xc   : > { %p45_p0 = scmp.ne.s32.totalorder %s1115_s19, %s1111_s18  ;;  %p1368_p1 = scmp.eq.s32.totalorder %s1186_s0, 0 }
   0xd   : > { %p117_p3 = scmp.eq.s32.totalorder %s799_s22, 1  ;;  %p800_p5 = scmp.ge.s32.totalorder %s1123_s21, 1 }
   0xe   : > { %p1195_p4 = por %p1368_p1, %p45_p0  ;;  %p124_p7 = scmp.lt.s32.totalorder %s1123_s21, 3 }
   0xf   : > { %p1200_p6 = por %p117_p3, %p45_p0  ;;  %s1126_s26 = smov [#allocation7]  }
  0x10   : > { %s1372_s23 = scalar_select %p1195_p4, 1, 0 }
  0x11   : > { %s1373_s24 = scalar_select %p1200_p6, 1, 0 }
  0x12   : > { %p1205_p8 = pnand %p800_p5, %p124_p7  ;;  %s136_s27 = sshll.u32 %s1126_s26, 4  ;;  %s137_s27 = int_to_ptr.vmem [resolvable:$true] %s136_s27 }
  0x13   : > { %s1127_s29 = smov [#allocation9]   ;;  %s984_s5 = scalar_lea.vmem %s137_s27, 1536 }
  0x14   : > { %s1374_s25 = scalar_select %p1205_p8, 1, 0 }
  0x15   : > { %p876_p9 = pneg %p1205_p8  ;;  %s150_s30 = sshll.u32 %s1127_s29, 4  ;;  %s151_s30 = int_to_ptr.vmem [resolvable:$true] %s150_s30 }
  0x16   : > { %p985_p13 = scmp.ne.s32.totalorder %s137_s27, %s984_s5  ;;  %p992_p5 = scmp.lt.s32.totalorder %s137_s27, %s137_s27 }
  0x17   : > { %p1214_p11 = pnand %p876_p9, %p1368_p1  ;;  %p993_p7 = scmp.lt.s32.totalorder %s984_s5, %s984_s5 }
  0x19   : > { %p975_p12 = pneg %p1214_p11  ;;  %p994_p10 = por %p993_p7, %p992_p5 }
  0x1b   : > { %p987_p0 = pnand %p985_p13, %p975_p12 }
  0x1d   : > { %p988_p3 = pneg %p987_p0 }
  0x1f   : > { %p995_p9 = pnand %p994_p10, %p988_p3 }
  0x21   : > { %998 = shalt.err (!%p995_p9)
}
  0x22   : > { %s1128_s6 = smov 384   ;;  %s1129_s7 = smov 24  }
  0x23   : > { %879 = dma.hbm_to_vmem [thread:$0]  (!%p1214_p11), %s1365_s2, 1536, %s137_s27, [#allocation8], %s1128_s6, %s1128_s6, %s1129_s7  }
  0x24   : > { %s1010_s10 = scalar_lea.vmem %s151_s30, 96  ;;  %p1018_p2 = scmp.lt.s32.totalorder %s151_s30, %s151_s30 }
  0x25   : > { %p1011_p1 = scmp.ne.s32.totalorder %s151_s30, %s1010_s10  ;;  %p1019_p6 = scmp.lt.s32.totalorder %s1010_s10, %s1010_s10 }
  0x27   : > { %p1013_p13 = pnand %p1011_p1, %p975_p12  ;;  %p1020_p5 = por %p1019_p6, %p1018_p2 }
  0x29   : > { %p1014_p0 = pneg %p1013_p13 }
  0x2b   : > { %p1021_p10 = pnand %p1020_p5, %p1014_p0 }
  0x2d   : > { %1024 = shalt.err (!%p1021_p10)
}
  0x2e   : > { %882 = dma.hbm_to_vmem [thread:$0]  (!%p1214_p11), %s1366_s3, 96, %s151_s30, [#allocation8]  }
  0x2f   : > { %s1237_s13 = sadd.s32 1, %s1123_s21   ;;  %s32_s14 = sadd.s32 1, %s1119_s20 }
  0x30   : > { %s29_s15 = ssub.s32 %s1123_s21, %s1237_s13  ;;  %p39_p1 = scmp.ne.s32.totalorder %s1119_s20, %s1115_s19 }
  0x31   : > { %p30_p2 = scmp.eq.s32.totalorder %s29_s15, 0  ;;  %p40_p6 = scmp.eq.s32.totalorder %s1123_s21, 0 }
  0x32   : > { %p1376_p12 = scmp.eq.s32.totalorder %s1186_s0, 1  ;;  %p893_p7 = scmp.lt.s32.totalorder %s1123_s21, 2 }
  0x33   : > { %s1253_s17 = scalar_select %p30_p2, %s1119_s20, %s32_s14  }
  0x34   : > { %p1247_p3 = por %p1376_p12, %p39_p1  ;;  %p41_p9 = por %p40_p6, %p39_p1 }
  0x35   : > { %s161_s22 = sand.u32 1, %s1119_s20   ;;  %s805_s27 = sshll.u32 %s1123_s21, 7 }
  0x36   : > { %s1377_s16 = scalar_select %p1247_p3, 1, 0 }
  0x37   : > { %s804_s26 = sshll.u32 %s161_s22, 3  ;;  %s1260_s30 = scalar_lea.hbm %s1364_s1, %s805_s27 }
  0x38   : > { %s165_s5 = scalar_lea.vmem [#allocation4], %s804_s26  ;;  %p1262_p11 = pnand %p893_p7, %p41_p9 }
  0x39   : > { %s172_s6 = sshll.u32 %s165_s5, 4  ;;  %s162_s8 = scalar_lea.sflag [#allocation5], %s161_s22  ;;  %s173_s6 = int_to_ptr.vmem [resolvable:$true] %s172_s6 }
  0x3a   : > { %s1025_s9 = scalar_lea.hbm %s1260_s30, 128  ;;  %p1027_p0 = pneg %p1262_p11 }
  0x3b   : > { %p1026_p13 = scmp.ne.s32.totalorder %s1260_s30, %s1025_s9  ;;  %s1030_s12 = scalar_lea.hbm %s1364_s1, 256 }
  0x3c   : > { %p1031_p1 = scmp.lt.s32.totalorder %s1260_s30, %s1364_s1  ;;  %p1032_p2 = scmp.lt.s32.totalorder %s1030_s12, %s1025_s9 }
  0x3d   : > { %p1028_p5 = pnand %p1027_p0, %p1026_p13 }
  0x3e   : > { %p1033_p6 = por %p1032_p2, %p1031_p1 }
  0x3f   : > { %p1029_p10 = pneg %p1028_p5 }
  0x41   : > { %p1034_p12 = pnand %p1033_p6, %p1029_p10 }
  0x43   : > { %1037 = shalt.err (!%p1034_p12)
}
  0x44   : > { %s1038_s26 = scalar_lea.vmem %s173_s6, 128  ;;  %s1130_s22 = smov [#allocation4]  }
  0x45   : > { %p1039_p7 = scmp.ne.s32.totalorder %s173_s6, %s1038_s26  ;;  %s1043_s27 = sshll.u32 %s1130_s22, 4  ;;  %s1044_s27 = int_to_ptr.vmem [resolvable:$false] %s1043_s27 }
  0x46   : > { %s1045_s28 = scalar_lea.vmem %s1044_s27, 256  ;;  %p1046_p13 = scmp.lt.s32.totalorder %s173_s6, %s1044_s27 }
  0x47   : > { %p1041_p9 = pnand %p1039_p7, %p1027_p0  ;;  %p1047_p5 = scmp.lt.s32.totalorder %s1045_s28, %s1038_s26 }
  0x49   : > { %p1042_p3 = pneg %p1041_p9  ;;  %p1048_p4 = por %p1047_p5, %p1046_p13 }
  0x4b   : > { %p1049_p8 = pnand %p1048_p4, %p1042_p3 }
  0x4d   : > { %1052 = shalt.err (!%p1049_p8)
}
  0x4e   : > { %886 = dma.hbm_to_vmem [thread:$0]  (!%p1262_p11), %s1260_s30, 128, %s173_s6, %s162_s8  }
  0x4f   : > { %p1379_p10 = scmp.ne.s32.totalorder %s1374_s25, 0 }
  0x50   : > { %s1283_s29 = sand.u32 (!%p1379_p10), 1, %s1115_s19   ;;  %p1380_p4 = scmp.ne.s32.totalorder (!%p1379_p10), %s1372_s23, 0 }
  0x51   : > { %181 = sbr.rel (%p1379_p10) target bundleno = 1145 (0x479), region = 32  ;;  %s807_s5 = sshll.u32 (!%p1379_p10), %s1283_s29, 3 }
  0x52   : > { %s184_s9 = scalar_lea.sflag (!%p1379_p10), [#allocation5], %s1283_s29  ;;  %s187_s10 = scalar_lea.vmem (!%p1379_p10), [#allocation4], %s807_s5 }
  0x56   : > { %1098 = dma.done.wait (%p1380_p4), %s184_s9, 128  }
  0x57   : > { %1100 = vsyncadd (%p1380_p4), %s184_s9, 4294967168  ;;  %p1381_p8 = scmp.eq.s32.totalorder %s1186_s0, 0 }
  0x59   : > { %1102 = dma.done.wait (%p1381_p8), [#allocation8], 1632   ;;  %p1382_p3 = pmov %p1381_p8 }
  0x5a   : > { %v1131_v0 = vmov 0   ;;  %v939_v1 = vld [vmem:[#allocation7 + $0x34] ss:$24 sps:$4 sm:$0xff]   ;;  %v941_v2 = vld [vmem:[#allocation7 + $0x30] ss:$24 sps:$4 sm:$0xff]   ;;  %vm358_vm0 = vcmask 261120   ;;  %v219_v15 = vlaneseq }
  0x5b   : > { %1104 = vsyncadd (%p1382_p3), [#allocation8], 4294965664  ;;  %394 = vmatprep.mubr.bf16.mxu0 %v1131_v0  ;;  %435 = vmatprep.mubr.bf16.mxu1 %v1131_v0  ;;  %v942_v3 = vld [vmem:[#allocation7 + $0x4] ss:$24 sps:$4 sm:$0xff]   ;;  %v944_v4 = vld [vmem:[#allocation7] ss:$24 sps:$4 sm:$0xff]  }
  0x5c   : > { %374 = vmatprep.subr.bf16.mxu0 %v939_v1  ;;  %v225_v5 = vld [vmem:[%s187_s10] sm:$0xff]  ;;  %v954_v11 = vld [vmem:[#allocation7 + $0xc] ss:$24 sps:$4 sm:$0xff]   ;;  %v956_v13 = vld [vmem:[#allocation7 + $0x8] ss:$24 sps:$4 sm:$0xff]   ;;  %v245_v16 = vshrl.u32 %v219_v15, 7 }
  0x5d   : > { %375 = vmatpush1.bf16.msra.mxu0 %v941_v2  ;;  %v947_v6 = vld [vmem:[#allocation7 + $0x44] ss:$24 sps:$4 sm:$0xff]   ;;  %v950_v8 = vld [vmem:[#allocation7 + $0x38] ss:$24 sps:$4 sm:$0xff]   ;;  %v226_v9 = vpack.c.bf16 %v225_v5, %v225_v5  ;;  %v953_v12 = vld [vmem:[#allocation7 + $0x14] ss:$24 sps:$4 sm:$0xff]  }
  0x5e   : > { %376 = vmatprep.subr.bf16.mxu0 %v942_v3  ;;  %v948_v7 = vld [vmem:[#allocation7 + $0x3c] ss:$24 sps:$4 sm:$0xff]   ;;  %v945_v10 = vld [vmem:[#allocation7 + $0x40] ss:$24 sps:$4 sm:$0xff]   ;;  %v951_v14 = vld [vmem:[#allocation7 + $0x10] ss:$24 sps:$4 sm:$0xff]  }
  0x5f   : > { %415 = vmatprep.subr.bf16.mxu1 %v948_v7  ;;  %v239_v17 = vld [vmem:[#allocation9] sm:$0x3f]  ;;  %v250_v18 = vsub.s32 2, %v245_v16  ;;  %v1132_v20 = vmov 0.0   ;;  %vm1133_vm1 = vmmov 0   ;;  %v254_v23 = vsub.s32 4, %v245_v16 }
  0x60   : > { %416 = vmatpush1.bf16.msra.mxu1 %v950_v8  ;;  %v241_v19 = vunpack.c.h.bf16 %v239_v17  ;;  %v240_v22 = vunpack.c.l.bf16 %v239_v17  ;;  %v246_v25 = vsub.s32 0, %v245_v16  ;;  %v258_v36 = vsub.s32 6, %v245_v16  ;;  %s221_s23 = sld [smem:[#allocation3 + %s1186_s0]]  ;;  %s1135_s25 = smov 16  }
  0x61   : > { %377 = vmatpush1.bf16.msra.mxu0 %v944_v4  ;;  %417 = vmatprep.subr.bf16.mxu1 %v954_v11  ;;  %vm544_vm2 = vcmask 1043456   ;;  %v220_v63 = vand.u32 127, %v219_v15  ;;  %v1134_v1 = vmov -10000.0   ;;  %vm528_vm4 = vcmask 64512   ;;  %s829_s30 = sshll.u32 %s1186_s0, 7  ;;  %s217_s6 = scalar_lea.vmem [#allocation10], %s807_s5 }
  0x62   : > { %456 = vmatprep.subr.bf16.mxu0 %v947_v6  ;;  %v267_v21 = vrot.slane %v241_v19, %v250_v18  ;;  %v251_v24 = vrot.slane %v240_v22, %v250_v18  ;;  %v255_v26 = vrot.slane %v240_v22, %v254_v23  ;;  %v247_v28 = vrot.slane %v240_v22, %v246_v25  ;;  %s710_s7 = sshll.u32 %s217_s6, 4  ;;  %s1325_s12 = scalar_lea.hbm %s1367_s4, %s829_s30  ;;  %s711_s7 = int_to_ptr.vmem [resolvable:$true] %s710_s7 }
  0x63   : > { %v263_v30 = vrot.slane %v241_v19, %v246_v25  ;;  %v259_v47 = vrot.slane %v240_v22, %v258_v36  ;;  %vm693_vm5 = vcmask 130048   ;;  %s697_s14 = scalar_lea.sflag [#allocation6], %s1283_s29  ;;  %s1053_s15 = scalar_lea.vmem %s711_s7, 128 }
  0x64   : > { %823 = vmatmul.mubr.msk.bf16.vlgmr.msra.gmra.mxu0 %vm358_vm0, %v226_v9  ;;  %418 = vmatpush1.bf16.msra.mxu1 %v956_v13  ;;  %v281_v27 = vrot.slane %v251_v24, %v246_v25  ;;  %v285_v32 = vrot.slane %v255_v26, %v246_v25  ;;  %v277_v34 = vrot.slane %v247_v28, %v246_v25  ;;  %p1054_p11 = scmp.ne.s32.totalorder %s711_s7, %s1053_s15  ;;  %p1383_p0 = scmp.ne.s32.totalorder %s1377_s16, 0 }
  0x65   : > { %457 = vmatpush1.bf16.msra.mxu0 %v945_v10  ;;  %476 = vmatprep.mubr.bf16.mxu0 %v1131_v0  ;;  %v293_v38 = vrot.slane %v263_v30, %v246_v25  ;;  %v297_v42 = vrot.slane %v267_v21, %v246_v25  ;;  %v289_v56 = vrot.slane %v259_v47, %v246_v25  ;;  %s1136_s0 = smov [#allocation10]  }
  0x66   : > { %458 = vmatprep.subr.bf16.mxu0 %v953_v12  ;;  %840 = vmatprep.subr.bf16.mxu1 %v1132_v20  ;;  %v222_v0 = vstv %s221_s23  ;;  %p1055_p1 = pnand %p1054_p11, %p1383_p0  ;;  %s1057_s26 = sshll.u32 %s1136_s0, 4  ;;  %s1058_s26 = int_to_ptr.vmem [resolvable:$false] %s1057_s26 }
  0x67   : > { %824 = vmatmul.mubr.msk.bf16.vlgmr.msra.gmra.mxu1 %vm358_vm0, %v226_v9  ;;  %vm223_vm3 = vcmp.lt.s32.totalorder %v220_v63, %v222_v0  ;;  %s1059_s22 = scalar_lea.vmem %s1058_s26, 256  ;;  %p1060_p6 = scmp.lt.s32.totalorder %s711_s7, %s1058_s26 }
  0x68   : > { %842 = vmatprep.mubr.msk.bf16.mxu1 %vm1133_vm1, %v1132_v20  ;;  %v224_v2 = vsel %vm223_vm3, 0.0, %v1134_v1  ;;  %p1056_p2 = pneg %p1055_p1  ;;  %p1061_p12 = scmp.lt.s32.totalorder %s1059_s22, %s1053_s15 }
  0x69   : > { %459 = vmatpush1.bf16.msra.mxu0 %v951_v14 }
  0x6a   : > { %846 = vmatprep.subr.bf16.mxu0 %v1132_v20  ;;  %p1062_p7 = por %p1061_p12, %p1060_p6 }
  0x6c   : > { %825 = vmatmul.mubr.msk.bf16.vlgmr.msra.gmra.mxu0 %vm358_vm0, %v226_v9  ;;  %p1063_p9 = pnand %p1062_p7, %p1056_p2 }
  0x6d   : > { %848 = vmatprep.mubr.msk.bf16.mxu0 %vm1133_vm1, %v1132_v20 }
 0x124   : > { %v396_v29 = vpop.f32.mrf.mxu0 }
 0x125   : > { %v397_v44 = vadd.f32 %v396_v29, %v277_v34 }
 0x126   : > { %v398_v31 = vpop.f32.mrf.mxu0 }
 0x127   : > { %v399_v33 = vadd.f32 %v398_v31, %v281_v27  ;;  %v437_v39 = vpop.f32.mrf.mxu1  ;;  %v485_v55 = vpack.c.bf16 %v397_v44, %v397_v44 }
 0x128   : > { %v400_v35 = vpop.f32.mrf.mxu0  ;;  %v438_v41 = vadd.f32 %v437_v39, %v285_v32 }
 0x129   : > { %v486_v37 = vpack.c.bf16 %v399_v33, %v399_v33  ;;  %v439_v43 = vpop.f32.mrf.mxu1 }
 0x12a   : > { %v401_v40 = vpop.f32.mrf.mxu0  ;;  %v487_v46 = vpack.c.bf16 %v438_v41, %v438_v41  ;;  %v440_v61 = vadd.f32 %v439_v43, %v289_v56 }
 0x12b   : > { %841 = vmatpush3.bf16.xpose.msra.mxu1 %v486_v37  ;;  %v441_v49 = vpop.f32.mrf.mxu1 }
 0x12c   : > { %v478_v45 = vpop.f32.mrf.mxu0  ;;  %852 = vmatprep.subr.bf16.mxu1 %v1132_v20  ;;  %v546_v50 = vsel %vm544_vm2, %v487_v46, 0  ;;  %v588_v62 = vpack.c.bf16 %v440_v61, %v440_v61 }
 0x12d   : > { %v479_v48 = vadd.f32 %v478_v45, %v293_v38  ;;  %v442_v54 = vpop.f32.mrf.mxu1  ;;  %847 = vmatpush3.bf16.msra.mxu0 %v546_v50 }
 0x12e   : > { %v480_v51 = vpop.f32.mrf.mxu0  ;;  %858 = vmatprep.subr.bf16.mxu0 %v1132_v20 }
 0x12f   : > { %v589_v52 = vpack.c.bf16 %v479_v48, %v479_v48  ;;  %v481_v53 = vadd.f32 %v480_v51, %v297_v42 }
 0x130   : > { %v482_v57 = vpop.f32.mrf.mxu0 }
 0x131   : > { %v590_v58 = vpack.c.bf16 %v481_v53, %v481_v53 }
 0x132   : > { %v483_v59 = vpop.f32.mrf.mxu0  ;;  %843 = vmatmul.mubr.bf16.vlgmr.msra.gmra.mxu1 %v485_v55 }
 0x133   : > { %v647_v60 = vsel %vm544_vm2, %v590_v58, 0  ;;  %853 = vmatpush3.bf16.xpose.msra.mxu1 %v589_v52  ;;  %854 = vmatprep.mubr.msk.bf16.mxu1 %vm1133_vm1, %v1132_v20 }
 0x13a   : > { %855 = vmatmul.mubr.bf16.vlgmr.msra.gmra.mxu1 %v588_v62 }
 0x1f2   : > { %v522_v3 = vpop.f32.mrf.mxu1 }
 0x1f3   : > { %v523_v4 = vadd.f32 %v522_v3, %v224_v2 }
 0x1f4   : > { %v844_v5 = vpop.f32.mrf.mxu1 }
 0x1f5   : > { %v529_v6 = vsel %vm528_vm4, %v523_v4, -inf }
 0x1f6   : > { %v525_v7 = vpop.f32.mrf.mxu1  ;;  %530 = vmax.xlane.f32.xlu0 %v529_v6 }
 0x1f8   : > { %v845_v8 = vpop.f32.mrf.mxu1 }
 0x1fa   : > { %v625_v9 = vpop.f32.mrf.mxu1 }
 0x1fb   : > { %v626_v10 = vadd.f32 %v625_v9, %v224_v2 }
 0x1fc   : > { %v856_v11 = vpop.f32.mrf.mxu1 }
 0x1fd   : > { %v631_v12 = vsel %vm528_vm4, %v626_v10, -inf }
 0x1fe   : > { %v628_v13 = vpop.f32.mrf.mxu1  ;;  %632 = vmax.xlane.f32.xlu0 %v631_v12 }
 0x200   : > { %v857_v14 = vpop.f32.mrf.mxu1 }
 0x27f   : > { %v531_v15 = vpop.xlane.xlu0 %530 }
 0x280   : > { %v532_v16 = vsub.f32 %v523_v4, %v531_v15 }
 0x282   : > { %v533_v17 = vmul.f32 1.442695, %v532_v16 }
 0x284   : > { %957 = vpow2.f32 %v533_v17 }
 0x287   : > { %v633_v18 = vpop.xlane.xlu0 %632 }
 0x288   : > { %v634_v19 = vsub.f32 %v626_v10, %v633_v18 }
 0x28a   : > { %v635_v21 = vmul.f32 1.442695, %v634_v19 }
 0x28c   : > { %959 = vpow2.f32 %v635_v21 }
 0x291   : > { %v958_v22 = vpop.eup %957 }
 0x292   : > { %v535_v23 = vsel %vm528_vm4, %v958_v22, 0.0 }
 0x293   : > { %536 = vadd.xlane.f32.xlu1 %v535_v23 }
 0x299   : > { %v960_v24 = vpop.eup %959 }
 0x29a   : > { %v637_v25 = vsel %vm528_vm4, %v960_v24, 0.0 }
 0x29b   : > { %638 = vadd.xlane.f32.xlu1 %v637_v25 }
 0x31c   : > { %v537_v26 = vpop.xlane.xlu1 %536 }
 0x31d   : > { %961 = vrcp.f32 %v537_v26 }
 0x324   : > { %v639_v27 = vpop.xlane.xlu1 %638 }
 0x325   : > { %963 = vrcp.f32 %v639_v27 }
 0x32a   : > { %v962_v28 = vpop.eup %961 }
 0x32b   : > { %v539_v29 = vmul.f32 %v962_v28, %v958_v22 }
 0x32d   : > { %v540_v30 = vpack.c.bf16 %v539_v29, %v539_v29 }
 0x32f   : > { %849 = vmatmul.mubr.msk.bf16.vlgmr.msra.gmra.mxu0 %vm528_vm4, %v540_v30 }
 0x330   : > { %859 = vmatpush3.bf16.msra.mxu0 %v647_v60  ;;  %860 = vmatprep.mubr.msk.bf16.mxu0 %vm1133_vm1, %v1132_v20 }
 0x332   : > { %v964_v31 = vpop.eup %963 }
 0x333   : > { %v641_v32 = vmul.f32 %v964_v31, %v960_v24 }
 0x335   : > { %v642_v33 = vpack.c.bf16 %v641_v32, %v641_v32 }
 0x337   : > { %861 = vmatmul.mubr.msk.bf16.vlgmr.msra.gmra.mxu0 %vm528_vm4, %v642_v33 }
 0x3ef   : > { %v582_v34 = vpop.f32.mrf.mxu0 }
 0x3f1   : > { %v850_v35 = vpop.f32.mrf.mxu0 }
 0x3f3   : > { %v585_v36 = vpop.f32.mrf.mxu0 }
 0x3f5   : > { %v851_v37 = vpop.f32.mrf.mxu0 }
 0x3f7   : > { %v683_v38 = vpop.f32.mrf.mxu0 }
 0x3f8   : > { %690 = vrot.lane.b32.xlu0 %v683_v38, %s1135_s25 }
 0x3f9   : > { %v862_v39 = vpop.f32.mrf.mxu0 }
 0x3fb   : > { %v686_v40 = vpop.f32.mrf.mxu0 }
 0x3fd   : > { %v863_v41 = vpop.f32.mrf.mxu0 }
 0x46a   : > { %v691_v20 = vpop.permute.xlu0 %690 }
 0x46b   : > { %v694_v42 = vsel %vm693_vm5, %v582_v34, %v691_v20 }
 0x46c   : > { %695 = vst.msk [vmem:[%s217_s6] sm:$0xff] %vm358_vm0, %v694_v42 }
 0x46d   : > { %1066 = shalt.err (!%p1063_p9)
}
 0x46e   : > { %s1067_s27 = scalar_lea.hbm %s1325_s12, 128  ;;  %s1071_s5 = scalar_lea.hbm %s1367_s4, 256 }
 0x46f   : > { %p1068_p13 = scmp.ne.s32.totalorder %s1325_s12, %s1067_s27  ;;  %p1072_p4 = scmp.lt.s32.totalorder %s1325_s12, %s1367_s4 }
 0x470   : > { %p1073_p8 = scmp.lt.s32.totalorder %s1071_s5, %s1067_s27 }
 0x471   : > { %p1069_p5 = pnand %p1068_p13, %p1383_p0 }
 0x472   : > { %p1074_p3 = por %p1073_p8, %p1072_p4 }
 0x473   : > { %p1070_p10 = pneg %p1069_p5 }
 0x475   : > { %p1075_p11 = pnand %p1074_p3, %p1070_p10 }
 0x477   : > { %1078 = shalt.err (!%p1075_p11)
}
 0x478   : > { %874 = dma.vmem_to_hbm [thread:$0]  (%p1383_p0), %s711_s7, 128, %s1325_s12, %s697_s14  }
 0x479 PF: > { %s722_s23 = sand.u32 1, %s1111_s18   ;;  %p1384_p1 = scmp.ne.s32.totalorder %s1373_s24, 0 }
 0x47a   : > { %p1385_p2 = scmp.ge.s32.totalorder %s1123_s21, 2  ;;  %s723_s25 = scalar_lea.sflag [#allocation6], %s722_s23 }
 0x47c   : > { %p888_p6 = pnand %p1385_p2, %p1384_p1 }
 0x47e   : > { %p889_p12 = pneg %p888_p6 }
 0x480   : > { %1106 = dma.done.wait (%p889_p12), %s723_s25, 128  }
 0x481   : > { %1108 = vsyncadd (%p889_p12), %s723_s25, 4294967168  ;;  %p22_p7 = scmp.ge.s32.totalorder %s1237_s13, 4   ;;  %s1386_s18 = smov %s1115_s19 }
 0x482   : > { %s1387_s19 = smov %s1119_s20  ;;  %s1388_s20 = smov %s1253_s17 }
 0x483   : > { %s1389_s21 = smov %s1237_s13  ;;  %24 = sbr.rel (!%p22_p7) target bundleno = 11 (0xb), region = 85 }
 0x488   :  { %728 = vsyncpa [#allocation5], 1 }
 0x489   :  { %730 = vsyncpa [#allocation5 + $0x1], 1 }
 0x48a   :  { %731 = vsyncpa [#allocation8], 1 }
 0x48b   :  { %732 = vsyncpa [#allocation6], 1 }
 0x48c   :  { %734 = vsyncpa [#allocation6 + $0x1], 1 }

</bundles_post_ra>
